<compile_context>
chip_gen: v7x
topology: tpu7x:2x2x1
jax: 0.10.0
libtpu: 0.0.40
codegen_flags: <defaults>
</compile_context>

<pallas_src>
import math

import jax
import jax.numpy as jnp
from jax.experimental import pallas as pl
from jax.experimental.pallas import tpu as pltpu

_LANE = 128                              # lane-dense last dim -> unmasked vst
_TARGET_BLOCK_BYTES = 4 * 1024 * 1024    # ~4 MiB/block; 4 buffers => ~16 MiB VMEM
_VMEM_LIMIT_BYTES = 32 * 1024 * 1024     # safe on v5e/v6e (128 MiB phys) and v7x (64 MiB phys)
_INV_SCALE = 1.0 / 0.596


def _mp_silu_kernel(x_ref, o_ref):
    # x_ref / o_ref: (tb, 128) tiles. sigmoid lowers to the EUP path,
    # the two multiplies are VPU work; scale constant folded at trace time.
    x = x_ref[...].astype(jnp.float32)
    o_ref[...] = (x * jax.nn.sigmoid(x) * _INV_SCALE).astype(o_ref.dtype)


def _round_up(v, m):
    return ((v + m - 1) // m) * m


def _round_down(v, m):
    return (v // m) * m


def mp_silu(x):
    """MPSiLU forward: silu(x) / 0.596, elementwise, any shape."""
    orig_shape = x.shape
    orig_dtype = x.dtype
    n = math.prod(orig_shape) if orig_shape else 1
    if n == 0:
        return x

    itemsize = jnp.dtype(orig_dtype).itemsize
    # dtype-aware sublane packing: 8 rows (f32), 16 (bf16/f16), 32 (int8/fp8)
    sublane = max(8, 32 // itemsize)

    # --- lane-dense (rows, 128) slab; pad only to one sublane tile ----------
    rows = pl.cdiv(n, _LANE)
    rows_padded = _round_up(rows, sublane)
    n_padded = rows_padded * _LANE

    flat = x.reshape(-1)
    if n_padded != n:
        # Zero padding is exact: silu(0)/0.596 == 0. Only hit when n is not a
        # multiple of sublane*128; common shapes take the copy-free path.
        flat = jnp.pad(flat, (0, n_padded - n))
    x2d = flat.reshape(rows_padded, _LANE)

    # --- block size: ~4 MiB, dtype-aware, sublane-aligned -------------------
    tb = max(sublane, _round_down(_TARGET_BLOCK_BYTES // (_LANE * itemsize), sublane))
    if rows_padded <= tb:
        # Whole tensor fits in one block: split in two so a v7x megacore can
        # put one block on each TensorCore (no-op cost on v5e/v6e).
        tb = max(sublane, _round_up(pl.cdiv(rows_padded, 2), sublane))
    grid = (pl.cdiv(rows_padded, tb),)   # Pallas clips the ragged last block

    out2d = pl.pallas_call(
        _mp_silu_kernel,
        out_shape=jax.ShapeDtypeStruct((rows_padded, _LANE), orig_dtype),
        grid=grid,
        in_specs=[pl.BlockSpec((tb, _LANE), lambda i: (i, 0))],
        out_specs=pl.BlockSpec((tb, _LANE), lambda i: (i, 0)),
        compiler_params=pltpu.CompilerParams(
            dimension_semantics=("parallel",),
            vmem_limit_bytes=_VMEM_LIMIT_BYTES,
        ),
    )(x2d)

    out = out2d.reshape(-1)
    if n_padded != n:
        out = out[:n]
    return out.reshape(orig_shape)


if __name__ == "__main__":
    # Small shape consistent with the module's usage in an image model.
    B, C, H, W = 2, 4, 16, 16

    key = jax.random.PRNGKey(0)
    x = jax.random.normal(key, (B, C, H, W), dtype=jnp.float32)

    out = mp_silu(x)
    out = jax.block_until_ready(out)

    # Plain-JAX reference: silu(x) / 0.596
    ref = jax.nn.silu(x) / 0.596

    assert out.shape == x.shape
    assert out.dtype == x.dtype
    assert jnp.allclose(out, ref, atol=1e-5, rtol=1e-5)

    print("KERNEL_OK")
</pallas_src>

<mosaic_0001>
module attributes {stable_mosaic.version = 11 : i64} {
  func.func @_mp_silu_kernel(%arg0: i32, %arg1: memref<8x128xf32, #tpu.memory_space<vmem>>, %arg2: memref<8x128xf32, #tpu.memory_space<vmem>>) attributes {dimension_semantics = [#tpu.dimension_semantics<parallel>], iteration_bounds = array<i64: 2>, scalar_prefetch = 0 : i64, scratch_operands = 0 : i64, tpu.core_type = #tpu.core_type<tc>, window_params = [{transform_indices = @transform_0, window_bounds = array<i64: 8, 128>}, {transform_indices = @transform_1, window_bounds = array<i64: 8, 128>}]} {
    %c0 = arith.constant 0 : index
    %c0_0 = arith.constant 0 : index
    %0 = vector.load %arg1[%c0, %c0_0] : memref<8x128xf32, #tpu.memory_space<vmem>>, vector<8x128xf32>
    %1 = arith.negf %0 : vector<8x128xf32>
    %2 = math.exp %1 : vector<8x128xf32>
    %cst = arith.constant 1.000000e+00 : f32
    %3 = vector.broadcast %cst : f32 to vector<8x128xf32>
    %4 = arith.addf %3, %2 : vector<8x128xf32>
    %5 = arith.divf %3, %4 : vector<8x128xf32>
    %6 = arith.mulf %0, %5 : vector<8x128xf32>
    %cst_1 = arith.constant 1.67785239 : f32
    %7 = vector.broadcast %cst_1 : f32 to vector<8x128xf32>
    %8 = arith.mulf %6, %7 : vector<8x128xf32>
    %c0_2 = arith.constant 0 : index
    %c0_3 = arith.constant 0 : index
    %9 = vector.load %arg2[%c0_2, %c0_3] : memref<8x128xf32, #tpu.memory_space<vmem>>, vector<8x128xf32>
    tpu.vector_store %arg2[%c0_2, %c0_3], %8 {strides = array<i32>} : memref<8x128xf32, #tpu.memory_space<vmem>>, vector<8x128xf32>,
    return
  }
  func.func @transform_0(%arg0: i32) -> (i32, i32) {
    %c0_i32 = arith.constant 0 : i32
    %c0_i32_0 = arith.constant 0 : i32
    return %arg0, %c0_i32 : i32, i32
  }
  func.func @transform_1(%arg0: i32) -> (i32, i32) {
    %c0_i32 = arith.constant 0 : i32
    %c0_i32_0 = arith.constant 0 : i32
    return %arg0, %c0_i32 : i32, i32
  }
}

</mosaic_0001>

<bundles_post_ra>
// kernel: tpu_custom_call.1
= control target key start
LH: loop header
LB: loop body
LE: loop exit
PB: predicated region body
PF: predicated region fallthrough
CT: control target
= control target key end

     0   :  { %6 = vsyncpa [#allocation3], 0  ;;  %s560_s0 = inlined_call_operand.hbm [shape: f32[16,128], index: 0, kind: input, shape index: {}]   ;;  %s561_s1 = inlined_call_operand.hbm [shape: f32[16,128], index: 1, kind: output, shape index: {}]  }
   0x1   :  { %8 = vsyncpa [#allocation3 + $0x1], 0 }
   0x2   :  { %9 = vsyncpa [#allocation4], 0 }
   0x3   :  { %11 = vsyncpa [#allocation4 + $0x1], 0  ;;  %s399_s6 = smov 0   ;;  %s401_s7 = smov 0  }
   0x4   :  { %s403_s8 = smov 0   ;;  %s405_s9 = smov 0  }
   0x5 LB: > { %s420_s10 = sadd.s32 4294967295, %s385_s9   ;;  %s226_s11 = sadd.s32 4294967294, %s385_s9   ;;  %s385_s9 = sphi %s405_s9, %s576_s9   ;;  %s381_s8 = sphi %s403_s8, %s575_s8   ;;  %s377_s7 = sphi %s401_s7, %s574_s7   ;;  %s373_s6 = sphi %s399_s6, %s573_s6  }
   0x6   : > { %s424_s12 = sadd.s32 1, %s385_s9   ;;  %s24_s13 = sadd.s32 1, %s381_s8 }
   0x7   : > { %s21_s14 = ssub.s32 %s385_s9, %s424_s12  ;;  %p31_p0 = scmp.ne.s32.totalorder %s381_s8, %s377_s7 }
   0x8   : > { %p22_p1 = scmp.eq.s32.totalorder %s21_s14, 0  ;;  %p32_p2 = scmp.eq.s32.totalorder %s385_s9, 0 }
   0x9   : > { %p37_p3 = scmp.ne.s32.totalorder %s377_s7, %s373_s6  ;;  %p38_p4 = scmp.eq.s32.totalorder %s420_s10, 0 }
   0xa   : > { %s436_s15 = scalar_select %p22_p1, %s381_s8, %s24_s13  }
   0xb   : > { %p438_p5 = por %p32_p2, %p31_p0  ;;  %p442_p6 = por %p38_p4, %p37_p3 }
   0xc   : > { %p61_p7 = scmp.eq.s32.totalorder %s420_s10, 1  ;;  %p67_p8 = scmp.eq.s32.totalorder %s226_s11, 1 }
   0xd   : > { %p251_p10 = scmp.lt.s32.totalorder %s385_s9, 2  ;;  %s87_s20 = sand.u32 1, %s381_s8  }
   0xe   : > { %p449_p11 = por %p61_p7, %p31_p0  ;;  %p453_p12 = por %p67_p8, %p37_p3 }
   0xf   : > { %s230_s21 = sshll.u32 %s385_s9, 7  ;;  %s229_s22 = sshll.u32 %s87_s20, 3 }
  0x10   : > { %s565_s18 = scalar_select %p449_p11, 1, 0 }
  0x11   : > { %s566_s19 = scalar_select %p453_p12, 1, 0 }
  0x12   : > { %s462_s25 = scalar_lea.hbm %s560_s0, %s230_s21  ;;  %s91_s26 = scalar_lea.vmem [#allocation2], %s229_s22 }
  0x13   : > { %s98_s27 = sshll.u32 %s91_s26, 4  ;;  %p466_p13 = pnand %p251_p10, %p438_p5  ;;  %s470_s27 = int_to_ptr.vmem [resolvable:$true] %s98_s27 }
  0x14   : > { %s88_s29 = scalar_lea.sflag [#allocation3], %s87_s20  ;;  %s289_s30 = scalar_lea.hbm %s462_s25, 128 }
  0x15   : > { %p290_p2 = scmp.ne.s32.totalorder %s462_s25, %s289_s30  ;;  %p291_p3 = pneg %p466_p13 }
  0x16   : > { %s294_s4 = scalar_lea.hbm %s560_s0, 256  ;;  %p295_p5 = scmp.lt.u32.totalorder %s462_s25, %s560_s0 }
  0x17   : > { %p292_p4 = pnand %p291_p3, %p290_p2  ;;  %p296_p8 = scmp.lt.u32.totalorder %s294_s4, %s289_s30 }
  0x18   : > { %p298_p9 = scmp.lt.u32.totalorder %s289_s30, %s462_s25 }
  0x19   : > { %p293_p7 = pneg %p292_p4  ;;  %p297_p10 = por %p296_p8, %p295_p5 }
  0x1b   : > { %p299_p0 = por %p298_p9, %p297_p10 }
  0x1d   : > { %p300_p1 = pnand %p299_p0, %p293_p7 }
  0x1f   : > { %303 = shalt.err (!%p300_p1)
}
  0x20   : > { %s304_s13 = scalar_lea.vmem %s470_s27, 128  ;;  %s387_s14 = smov [#allocation2]  }
  0x21   : > { %p305_p2 = scmp.ne.s32.totalorder %s470_s27, %s304_s13  ;;  %s309_s16 = sshll.u32 %s387_s14, 4  ;;  %s310_s16 = int_to_ptr.vmem [resolvable:$false] %s309_s16 }
  0x22   : > { %s311_s20 = scalar_lea.vmem %s310_s16, 256  ;;  %p312_p11 = scmp.lt.s32.totalorder %s470_s27, %s310_s16 }
  0x23   : > { %p307_p4 = pnand %p305_p2, %p291_p3  ;;  %p313_p5 = scmp.lt.s32.totalorder %s311_s20, %s304_s13 }
  0x25   : > { %p308_p12 = pneg %p307_p4  ;;  %p314_p8 = por %p313_p5, %p312_p11 }
  0x27   : > { %p315_p9 = pnand %p314_p8, %p308_p12 }
  0x29   : > { %318 = shalt.err (!%p315_p9)
}
  0x2a   : > { %246 = dma.hbm_to_vmem [thread:$0]  (!%p466_p13), %s462_s25, 128, %s470_s27, %s88_s29  }
  0x2b   : > { %p568_p0 = scmp.lt.s32.totalorder %s385_s9, 3  ;;  %p569_p1 = scmp.ge.s32.totalorder %s385_s9, 1 }
  0x2d   : > { %p104_p3 = pnand %p569_p1, %p568_p0 }
  0x2e   : > { %s504_s21 = sand.u32 (!%p104_p3), 1, %s377_s7  }
  0x2f   : > { %107 = sbr.rel (%p104_p3) target bundleno = 100 (0x64), region = 24  ;;  %s232_s22 = sshll.u32 (!%p104_p3), %s504_s21, 3 }
  0x30   : > { %s110_s23 = scalar_lea.sflag (!%p104_p3), [#allocation3], %s504_s21  ;;  %s113_s24 = scalar_lea.vmem (!%p104_p3), [#allocation2], %s232_s22 }
  0x36   : > { %364 = dma.done.wait (%p442_p6), %s110_s23, 128  }
  0x37   : > { %366 = vsyncadd (%p442_p6), %s110_s23, 4294967168  ;;  %v132_v0 = vld [vmem:[%s113_s24] sm:$0xff]  ;;  %s131_s25 = scalar_lea.vmem [#allocation5], %s232_s22  ;;  %s236_s27 = sshll.u32 %s420_s10, 7 }
  0x38   : > { %v234_v1 = vmul.f32 -1.442695, %v132_v0  ;;  %s156_s26 = sshll.u32 %s131_s25, 4  ;;  %s518_s29 = scalar_lea.hbm %s561_s1, %s236_s27  ;;  %s513_s26 = int_to_ptr.vmem [resolvable:$true] %s156_s26 }
  0x39   : > { %s143_s30 = scalar_lea.sflag [#allocation4], %s504_s21  ;;  %s319_s2 = scalar_lea.vmem %s513_s26, 128 }
  0x3a   : > { %285 = vpow2.f32 %v234_v1  ;;  %p320_p6 = scmp.ne.s32.totalorder %s513_s26, %s319_s2  ;;  %p570_p11 = scmp.ne.s32.totalorder %s565_s18, 0 }
  0x3b   : > { %s388_s10 = smov [#allocation5]  }
  0x3c   : > { %p321_p12 = pnand %p320_p6, %p570_p11  ;;  %s323_s3 = sshll.u32 %s388_s10, 4  ;;  %s324_s3 = int_to_ptr.vmem [resolvable:$false] %s323_s3 }
  0x3d   : > { %s325_s4 = scalar_lea.vmem %s324_s3, 256  ;;  %p326_p7 = scmp.lt.s32.totalorder %s513_s26, %s324_s3 }
  0x3e   : > { %p322_p13 = pneg %p321_p12  ;;  %p327_p10 = scmp.lt.s32.totalorder %s325_s4, %s319_s2 }
  0x40   : > { %p328_p2 = por %p327_p10, %p326_p7 }
  0x42   : > { %p329_p4 = pnand %p328_p2, %p322_p13 }
  0x44   : > { %v286_v2 = vpop.eup %285 }
  0x45   : > { %v136_v3 = vadd.f32 1.0, %v286_v2 }
  0x47   : > { %287 = vrcp.f32 %v136_v3 }
  0x51   : > { %v288_v4 = vpop.eup %287 }
  0x52   : > { %v139_v5 = vmul.f32 %v288_v4, %v132_v0 }
  0x54   : > { %v140_v6 = vmul.f32 1.6778524, %v139_v5 }
  0x56   : > { %141 = vst [vmem:[%s131_s25] sm:$0xff] %v140_v6 }
  0x57   : > { %332 = shalt.err (!%p329_p4)
}
  0x58   : > { %s333_s5 = scalar_lea.hbm %s518_s29, 128  ;;  %s337_s14 = scalar_lea.hbm %s561_s1, 256 }
  0x59   : > { %p334_p5 = scmp.ne.s32.totalorder %s518_s29, %s333_s5  ;;  %p338_p0 = scmp.lt.u32.totalorder %s518_s29, %s561_s1 }
  0x5a   : > { %p339_p1 = scmp.lt.u32.totalorder %s337_s14, %s333_s5  ;;  %p341_p6 = scmp.lt.u32.totalorder %s333_s5, %s518_s29 }
  0x5b   : > { %p335_p8 = pnand %p334_p5, %p570_p11 }
  0x5c   : > { %p340_p3 = por %p339_p1, %p338_p0 }
  0x5d   : > { %p336_p9 = pneg %p335_p8 }
  0x5e   : > { %p342_p12 = por %p341_p6, %p340_p3 }
  0x60   : > { %p343_p13 = pnand %p342_p12, %p336_p9 }
  0x62   : > { %346 = shalt.err (!%p343_p13)
}
  0x63   : > { %241 = dma.vmem_to_hbm [thread:$0]  (%p570_p11), %s513_s26, 128, %s518_s29, %s143_s30  }
  0x64 PF: > { %s168_s21 = sand.u32 1, %s373_s6   ;;  %p571_p7 = scmp.ne.s32.totalorder %s566_s19, 0 }
  0x65   : > { %p572_p10 = scmp.ge.s32.totalorder %s385_s9, 2  ;;  %s169_s22 = scalar_lea.sflag [#allocation4], %s168_s21 }
  0x67   : > { %p248_p2 = pnand %p572_p10, %p571_p7 }
  0x69   : > { %368 = dma.done.wait (!%p248_p2), %s169_s22, 128  }
  0x6a   : > { %370 = vsyncadd (!%p248_p2), %s169_s22, 4294967168  ;;  %p14_p4 = scmp.ge.s32.totalorder %s424_s12, 4   ;;  %s573_s6 = smov %s377_s7 }
  0x6b   : > { %s574_s7 = smov %s381_s8  ;;  %s575_s8 = smov %s436_s15 }
  0x6c   : > { %s576_s9 = smov %s424_s12  ;;  %16 = sbr.rel (!%p14_p4) target bundleno = 5 (0x5), region = 69 }
  0x73   :  { %174 = vsyncpa [#allocation3], 1 }
  0x74   :  { %176 = vsyncpa [#allocation3 + $0x1], 1 }
  0x75   :  { %177 = vsyncpa [#allocation4], 1 }
  0x76   :  { %179 = vsyncpa [#allocation4 + $0x1], 1 }

</bundles_post_ra>
